<compile_context>
chip_gen: v7x
topology: tpu7x:2x2x1
jax: 0.10.0
libtpu: 0.0.40
codegen_flags: <defaults>
</compile_context>

<pallas_src>
import functools

import jax
import jax.numpy as jnp
from jax.experimental import pallas as pl
from jax.experimental.pallas import tpu as pltpu


def _round_up(n, m):
    return ((n + m - 1) // m) * m


def _nbytes(shape, dtype):
    n = 1
    for s in shape:
        n *= s
    return n * jnp.dtype(dtype).itemsize


def _vmem_limit(block_sizes):
    # Every BlockSpec buffer is double-buffered by the pipeline; add generous
    # headroom for in-kernel f32 intermediates and clamp safely below the
    # 64 MiB physical VMEM of a v7x TensorCore.
    total = sum(block_sizes)
    return int(min(2 * total + (16 << 20), 48 << 20))


# --------------------- pass 1: BatchNorm batch statistics --------------------

def _stats_kernel(x_ref, w1_ref, sum_ref, sq_ref):
    """Accumulate sum / sum-of-squares of d = x @ W1 (bias-free, shift-invariant)."""
    @pl.when(pl.program_id(0) == 0)
    def _():
        sum_ref[...] = jnp.zeros_like(sum_ref)
        sq_ref[...] = jnp.zeros_like(sq_ref)

    d = jnp.dot(x_ref[...], w1_ref[...], preferred_element_type=jnp.float32)
    # Zero-padded batch rows give d == 0 exactly -> no mask needed.
    sum_ref[...] += jnp.sum(d, axis=0, keepdims=True)
    sq_ref[...] += jnp.sum(d * d, axis=0, keepdims=True)


def _stats_stash_kernel(x_ref, w1_ref, b1_ref, h1_ref, sum_ref, sq_ref):
    """Same as _stats_kernel, but also stashes h1 = x@W1 + b1 (bf16) for pass 2."""
    @pl.when(pl.program_id(0) == 0)
    def _():
        sum_ref[...] = jnp.zeros_like(sum_ref)
        sq_ref[...] = jnp.zeros_like(sq_ref)

    d = jnp.dot(x_ref[...], w1_ref[...], preferred_element_type=jnp.float32)
    h1_ref[...] = (d + b1_ref[...]).astype(h1_ref.dtype)
    sum_ref[...] += jnp.sum(d, axis=0, keepdims=True)
    sq_ref[...] += jnp.sum(d * d, axis=0, keepdims=True)


# --------------------- pass 2: fused forward (BN folded) ---------------------

def _mlp_tail(h, w2_ref, b2_ref, w3_ref, b3_ref, w4_ref, b4_ref, o_ref):
    f32, bf16 = jnp.float32, jnp.bfloat16
    # Linear(512, 256) + ReLU
    h = jnp.dot(h.astype(bf16), w2_ref[...], preferred_element_type=f32) + b2_ref[...]
    h = jnp.maximum(h, 0.0)
    # Linear(256, 128) + ReLU
    h = jnp.dot(h.astype(bf16), w3_ref[...], preferred_element_type=f32) + b3_ref[...]
    h = jnp.maximum(h, 0.0)
    # Linear(128, 40) padded to 128 output lanes -> lane-dense unmasked store
    o_ref[...] = (jnp.dot(h.astype(bf16), w4_ref[...], preferred_element_type=f32)
                  + b4_ref[...]).astype(o_ref.dtype)


def _forward_from_x_kernel(x_ref, w1_ref, b1_ref, scale_ref, shift_ref,
                           w2_ref, b2_ref, w3_ref, b3_ref, w4_ref, b4_ref, o_ref):
    # Recompute layer 1 (cheap when Kp is small).
    h = jnp.dot(x_ref[...], w1_ref[...],
                preferred_element_type=jnp.float32) + b1_ref[...]
    h = jnp.maximum(h * scale_ref[...] + shift_ref[...], 0.0)
    _mlp_tail(h, w2_ref, b2_ref, w3_ref, b3_ref, w4_ref, b4_ref, o_ref)


def _forward_from_h1_kernel(h1_ref, scale_ref, shift_ref,
                            w2_ref, b2_ref, w3_ref, b3_ref, w4_ref, b4_ref, o_ref):
    # Consume stashed h1 (layer-1 matmul done once, in pass 1).
    h = jnp.maximum(h1_ref[...].astype(jnp.float32) * scale_ref[...]
                    + shift_ref[...], 0.0)
    _mlp_tail(h, w2_ref, b2_ref, w3_ref, b3_ref, w4_ref, b4_ref, o_ref)


# ------------------------------- wrapper --------------------------------------

def encoder_csf(x, params, *, block_b=1024):
    """x: (B, input_size) float32.  params: dict of pre-transposed (in, out) weights."""
    f32, bf16 = jnp.float32, jnp.bfloat16
    B, F = x.shape
    H1 = params["w1"].shape[1]          # 512
    H2 = params["w2"].shape[1]          # 256
    H3 = params["w3"].shape[1]          # 128
    n_out = params["w4"].shape[1]       # 40

    # layout prep: pad K to 128 lanes, batch tile to a multiple of 16 (bf16
    # sublane packing), output N to 128 lanes.
    Kp = _round_up(F, 128)
    TB = _round_up(min(block_b, max(B, 1)), 16)
    Bp = _round_up(B, TB)
    nb = Bp // TB
    Np = _round_up(n_out, 128)

    x_p = jnp.pad(x, ((0, Bp - B), (0, Kp - F))).astype(bf16)
    w1 = jnp.pad(params["w1"], ((0, Kp - F), (0, 0))).astype(bf16)
    b1 = params["b1"].reshape(1, -1).astype(f32)
    gamma = params["gamma"].reshape(1, -1).astype(f32)
    beta = params["beta"].reshape(1, -1).astype(f32)
    w2 = params["w2"].astype(bf16)
    b2 = params["b2"].reshape(1, -1).astype(f32)
    w3 = params["w3"].astype(bf16)
    b3 = params["b3"].reshape(1, -1).astype(f32)
    w4 = jnp.pad(params["w4"], ((0, 0), (0, Np - n_out))).astype(bf16)
    b4 = jnp.pad(params["b4"].reshape(1, -1), ((0, 0), (0, Np - n_out))).astype(f32)

    # Stash h1 when layer 1 is expensive enough that recomputing it (and
    # re-reading x) in pass 2 costs more than a (B,512) bf16 write+read.
    stash_h1 = Kp >= 512

    # ---- pass 1: global sum / sum-of-squares of d = x@W1 (accumulator) ----
    if stash_h1:
        blocks1 = [_nbytes((TB, Kp), bf16), _nbytes((Kp, H1), bf16),
                   _nbytes((1, H1), f32), _nbytes((TB, H1), bf16),
                   2 * _nbytes((1, H1), f32)]
        h1_stash, s, sq = pl.pallas_call(
            _stats_stash_kernel,
            out_shape=(jax.ShapeDtypeStruct((Bp, H1), bf16),
                       jax.ShapeDtypeStruct((1, H1), f32),
                       jax.ShapeDtypeStruct((1, H1), f32)),
            grid=(nb,),
            in_specs=[pl.BlockSpec((TB, Kp), lambda i: (i, 0)),
                      pl.BlockSpec((Kp, H1), lambda i: (0, 0)),
                      pl.BlockSpec((1, H1), lambda i: (0, 0))],
            out_specs=(pl.BlockSpec((TB, H1), lambda i: (i, 0)),
                       pl.BlockSpec((1, H1), lambda i: (0, 0)),
                       pl.BlockSpec((1, H1), lambda i: (0, 0))),
            compiler_params=pltpu.CompilerParams(
                dimension_semantics=("arbitrary",),
                vmem_limit_bytes=_vmem_limit(blocks1)),
        )(x_p, w1, b1)
    else:
        blocks1 = [_nbytes((TB, Kp), bf16), _nbytes((Kp, H1), bf16),
                   2 * _nbytes((1, H1), f32)]
        s, sq = pl.pallas_call(
            _stats_kernel,
            out_shape=(jax.ShapeDtypeStruct((1, H1), f32),
                       jax.ShapeDtypeStruct((1, H1), f32)),
            grid=(nb,),
            in_specs=[pl.BlockSpec((TB, Kp), lambda i: (i, 0)),
                      pl.BlockSpec((Kp, H1), lambda i: (0, 0))],
            out_specs=(pl.BlockSpec((1, H1), lambda i: (0, 0)),
                       pl.BlockSpec((1, H1), lambda i: (0, 0))),
            compiler_params=pltpu.CompilerParams(
                dimension_semantics=("arbitrary",),
                vmem_limit_bytes=_vmem_limit(blocks1)),
        )(x_p, w1)

    # Fold BN (train mode: biased variance, eps=1e-5) into scale/shift.
    # s/sq are statistics of the bias-free d = x@W1 over the B true rows
    # (zero-padded rows contribute exactly 0), so mean = s/B + b1 and the
    # variance is shift-invariant.
    mean_d = s / B
    mean = mean_d + b1
    var = jnp.maximum(sq / B - mean_d * mean_d, 0.0)
    rstd = jax.lax.rsqrt(var + 1e-5)
    scale = gamma * rstd
    shift = beta - mean * scale

    # ---- pass 2: batch-tiled fused forward (megacore-parallel) ----
    weight_specs = [pl.BlockSpec(w2.shape, lambda i: (0, 0)),
                    pl.BlockSpec(b2.shape, lambda i: (0, 0)),
                    pl.BlockSpec(w3.shape, lambda i: (0, 0)),
                    pl.BlockSpec(b3.shape, lambda i: (0, 0)),
                    pl.BlockSpec(w4.shape, lambda i: (0, 0)),
                    pl.BlockSpec(b4.shape, lambda i: (0, 0))]
    weight_blocks = [_nbytes(w2.shape, bf16), _nbytes(b2.shape, f32),
                     _nbytes(w3.shape, bf16), _nbytes(b3.shape, f32),
                     _nbytes(w4.shape, bf16), _nbytes(b4.shape, f32)]
    out_block = _nbytes((TB, Np), bf16)

    if stash_h1:
        blocks2 = [_nbytes((TB, H1), bf16), 2 * _nbytes((1, H1), f32),
                   out_block] + weight_blocks
        out = pl.pallas_call(
            _forward_from_h1_kernel,
            out_shape=jax.ShapeDtypeStruct((Bp, Np), bf16),
            grid=(nb,),
            in_specs=[pl.BlockSpec((TB, H1), lambda i: (i, 0)),   # stashed h1
                      pl.BlockSpec((1, H1), lambda i: (0, 0)),    # BN scale
                      pl.BlockSpec((1, H1), lambda i: (0, 0))]    # BN shift
                     + weight_specs,
            out_specs=pl.BlockSpec((TB, Np), lambda i: (i, 0)),
            compiler_params=pltpu.CompilerParams(
                dimension_semantics=("parallel",),
                vmem_limit_bytes=_vmem_limit(blocks2)),
        )(h1_stash, scale, shift, w2, b2, w3, b3, w4, b4)
    else:
        blocks2 = [_nbytes((TB, Kp), bf16), _nbytes((Kp, H1), bf16),
                   3 * _nbytes((1, H1), f32), out_block] + weight_blocks
        out = pl.pallas_call(
            _forward_from_x_kernel,
            out_shape=jax.ShapeDtypeStruct((Bp, Np), bf16),
            grid=(nb,),
            in_specs=[pl.BlockSpec((TB, Kp), lambda i: (i, 0)),   # x tile
                      pl.BlockSpec((Kp, H1), lambda i: (0, 0)),   # w1 (resident)
                      pl.BlockSpec((1, H1), lambda i: (0, 0)),    # b1
                      pl.BlockSpec((1, H1), lambda i: (0, 0)),    # BN scale
                      pl.BlockSpec((1, H1), lambda i: (0, 0))]    # BN shift
                     + weight_specs,
            out_specs=pl.BlockSpec((TB, Np), lambda i: (i, 0)),
            compiler_params=pltpu.CompilerParams(
                dimension_semantics=("parallel",),
                vmem_limit_bytes=_vmem_limit(blocks2)),
        )(x_p, w1, b1, scale, shift, w2, b2, w3, b3, w4, b4)

    return out[:B, :n_out].astype(f32)


# --------------------------- params / reference -------------------------------

def init_params(key, input_size):
    """Deterministic synthetic init (PyTorch-Linear-like uniform bounds)."""
    def linear(k, fan_in, fan_out):
        kw, kb = jax.random.split(k)
        bound = 1.0 / (fan_in ** 0.5)
        # stored as (in, out): already the transpose of PyTorch's (out, in)
        w = jax.random.uniform(kw, (fan_in, fan_out), jnp.float32, -bound, bound)
        b = jax.random.uniform(kb, (1, fan_out), jnp.float32, -bound, bound)
        return w, b

    k1, k2, k3, k4 = jax.random.split(key, 4)
    w1, b1 = linear(k1, input_size, 512)
    w2, b2 = linear(k2, 512, 256)
    w3, b3 = linear(k3, 256, 128)
    w4, b4 = linear(k4, 128, 40)
    gamma = jnp.ones((1, 512), jnp.float32)   # BatchNorm1d weight
    beta = jnp.zeros((1, 512), jnp.float32)   # BatchNorm1d bias
    return dict(w1=w1, b1=b1, gamma=gamma, beta=beta,
                w2=w2, b2=b2, w3=w3, b3=b3, w4=w4, b4=b4)


def encoder_csf_ref(x, p):
    """Pure-JAX f32 reference matching the PyTorch module (train-mode BN)."""
    h = x @ p["w1"] + p["b1"]
    mean = jnp.mean(h, axis=0, keepdims=True)
    var = jnp.mean((h - mean) ** 2, axis=0, keepdims=True)
    h = (h - mean) / jnp.sqrt(var + 1e-5) * p["gamma"] + p["beta"]
    h = jnp.maximum(h, 0.0)
    h = jnp.maximum(h @ p["w2"] + p["b2"], 0.0)
    h = jnp.maximum(h @ p["w3"] + p["b3"], 0.0)
    return h @ p["w4"] + p["b4"]


if __name__ == "__main__":
    key = jax.random.PRNGKey(0)
    kx, kp = jax.random.split(key)

    # ---- case 1: small input_size -> recompute path (Kp < 512) ----
    B, input_size = 8, 32
    x = jax.random.normal(kx, (B, input_size), jnp.float32)
    params = init_params(kp, input_size)

    fwd = jax.jit(encoder_csf)
    out = jax.block_until_ready(fwd(x, params))
    ref = jax.block_until_ready(encoder_csf_ref(x, params))
    assert out.shape == (B, 40), out.shape
    # bf16 matmul operands / bf16 output store -> loose tolerance vs f32 ref
    assert jnp.allclose(out, ref, atol=5e-2, rtol=5e-2), \
        float(jnp.max(jnp.abs(out - ref)))

    # ---- case 2: large input_size + small tiles -> h1-stash path, multi-tile
    #      two-phase BN with batch padding (Kp >= 512, nb > 1) ----
    B2, input_size2 = 44, 600
    x2 = jax.random.normal(jax.random.fold_in(kx, 1), (B2, input_size2), jnp.float32)
    params2 = init_params(jax.random.fold_in(kp, 1), input_size2)
    fwd_tiled = jax.jit(functools.partial(encoder_csf, block_b=16))
    out2 = jax.block_until_ready(fwd_tiled(x2, params2))
    ref2 = jax.block_until_ready(encoder_csf_ref(x2, params2))
    assert out2.shape == (B2, 40), out2.shape
    assert jnp.allclose(out2, ref2, atol=5e-2, rtol=5e-2), \
        float(jnp.max(jnp.abs(out2 - ref2)))

    print("KERNEL_OK")
</pallas_src>

<mosaic_0001>
module attributes {stable_mosaic.version = 11 : i64} {
  func.func @_stats_kernel(%arg0: i32, %arg1: memref<16x128xbf16, #tpu.memory_space<vmem>>, %arg2: memref<128x512xbf16, #tpu.memory_space<vmem>>, %arg3: memref<1x512xf32, #tpu.memory_space<vmem>>, %arg4: memref<1x512xf32, #tpu.memory_space<vmem>>) attributes {dimension_semantics = [#tpu.dimension_semantics<arbitrary>], iteration_bounds = array<i64: 1>, scalar_prefetch = 0 : i64, scratch_operands = 0 : i64, tpu.core_type = #tpu.core_type<tc>, window_params = [{transform_indices = @transform_0, window_bounds = array<i64: 16, 128>}, {pipeline_mode = #tpu.pipeline_mode<synchronous>, transform_indices = @transform_1, window_bounds = array<i64: 128, 512>}, {pipeline_mode = #tpu.pipeline_mode<synchronous>, transform_indices = @transform_2, window_bounds = array<i64: 1, 512>}, {pipeline_mode = #tpu.pipeline_mode<synchronous>, transform_indices = @transform_3, window_bounds = array<i64: 1, 512>}]} {
    %c0_i32 = arith.constant 0 : i32
    %0 = arith.cmpi eq, %arg0, %c0_i32 : i32
    %1 = arith.extui %0 : i1 to i32
    %c0_i32_0 = arith.constant 0 : i32
    %2 = arith.cmpi ne, %1, %c0_i32_0 : i32
    scf.if %2 {
      %cst_14 = arith.constant 0.000000e+00 : f32
      %17 = vector.broadcast %cst_14 : f32 to vector<1x512xf32>
      %c0_15 = arith.constant 0 : index
      %c0_16 = arith.constant 0 : index
      %18 = vector.load %arg3[%c0_15, %c0_16] : memref<1x512xf32, #tpu.memory_space<vmem>>, vector<1x512xf32>
      tpu.vector_store %arg3[%c0_15, %c0_16], %17 {strides = array<i32>} : memref<1x512xf32, #tpu.memory_space<vmem>>, vector<1x512xf32>,
      %cst_17 = arith.constant 0.000000e+00 : f32
      %19 = vector.broadcast %cst_17 : f32 to vector<1x512xf32>
      %c0_18 = arith.constant 0 : index
      %c0_19 = arith.constant 0 : index
      %20 = vector.load %arg4[%c0_18, %c0_19] : memref<1x512xf32, #tpu.memory_space<vmem>>, vector<1x512xf32>
      tpu.vector_store %arg4[%c0_18, %c0_19], %19 {strides = array<i32>} : memref<1x512xf32, #tpu.memory_space<vmem>>, vector<1x512xf32>,
    } else {
    }
    %c0 = arith.constant 0 : index
    %c0_1 = arith.constant 0 : index
    %3 = vector.load %arg1[%c0, %c0_1] : memref<16x128xbf16, #tpu.memory_space<vmem>>, vector<16x128xbf16>
    %c0_2 = arith.constant 0 : index
    %c0_3 = arith.constant 0 : index
    %4 = vector.load %arg2[%c0_2, %c0_3] : memref<128x512xbf16, #tpu.memory_space<vmem>>, vector<128x512xbf16>
    %cst = arith.constant dense<0.000000e+00> : vector<16x512xf32>
    %5 = tpu.matmul %3, %4, %cst {dimension_numbers = #tpu.dot_dimension_numbers<[1], [0], [0], [1], [0, 0, 1, 1], [], []>} : vector<16x128xbf16>, vector<128x512xbf16>, vector<16x512xf32> -> vector<16x512xf32>
    %c0_4 = arith.constant 0 : index
    %c0_5 = arith.constant 0 : index
    %6 = vector.load %arg3[%c0_4, %c0_5] : memref<1x512xf32, #tpu.memory_space<vmem>>, vector<1x512xf32>
    %cst_6 = arith.constant dense<0.000000e+00> : vector<512xf32>
    %7 = vector.multi_reduction <add>, %5, %cst_6 [0] : vector<16x512xf32> to vector<512xf32>
    %8 = vector.shape_cast %7 : vector<512xf32> to vector<1x512xf32>
    %9 = arith.addf %6, %8 : vector<1x512xf32>
    %c0_7 = arith.constant 0 : index
    %c0_8 = arith.constant 0 : index
    %10 = vector.load %arg3[%c0_7, %c0_8] : memref<1x512xf32, #tpu.memory_space<vmem>>, vector<1x512xf32>
    tpu.vector_store %arg3[%c0_7, %c0_8], %9 {strides = array<i32>} : memref<1x512xf32, #tpu.memory_space<vmem>>, vector<1x512xf32>,
    %c0_9 = arith.constant 0 : index
    %c0_10 = arith.constant 0 : index
    %11 = vector.load %arg4[%c0_9, %c0_10] : memref<1x512xf32, #tpu.memory_space<vmem>>, vector<1x512xf32>
    %12 = arith.mulf %5, %5 : vector<16x512xf32>
    %cst_11 = arith.constant dense<0.000000e+00> : vector<512xf32>
    %13 = vector.multi_reduction <add>, %12, %cst_11 [0] : vector<16x512xf32> to vector<512xf32>
    %14 = vector.shape_cast %13 : vector<512xf32> to vector<1x512xf32>
    %15 = arith.addf %11, %14 : vector<1x512xf32>
    %c0_12 = arith.constant 0 : index
    %c0_13 = arith.constant 0 : index
    %16 = vector.load %arg4[%c0_12, %c0_13] : memref<1x512xf32, #tpu.memory_space<vmem>>, vector<1x512xf32>
    tpu.vector_store %arg4[%c0_12, %c0_13], %15 {strides = array<i32>} : memref<1x512xf32, #tpu.memory_space<vmem>>, vector<1x512xf32>,
    return
  }
  func.func @transform_0(%arg0: i32) -> (i32, i32) {
    %c0_i32 = arith.constant 0 : i32
    %c0_i32_0 = arith.constant 0 : i32
    return %arg0, %c0_i32 : i32, i32
  }
  func.func @transform_1(%arg0: i32) -> (i32, i32) {
    %c0_i32 = arith.constant 0 : i32
    %c0_i32_0 = arith.constant 0 : i32
    %c0_i32_1 = arith.constant 0 : i32
    return %c0_i32, %c0_i32_0 : i32, i32
  }
  func.func @transform_2(%arg0: i32) -> (i32, i32) {
    %c0_i32 = arith.constant 0 : i32
    %c0_i32_0 = arith.constant 0 : i32
    %c0_i32_1 = arith.constant 0 : i32
    return %c0_i32, %c0_i32_0 : i32, i32
  }
  func.func @transform_3(%arg0: i32) -> (i32, i32) {
    %c0_i32 = arith.constant 0 : i32
    %c0_i32_0 = arith.constant 0 : i32
    %c0_i32_1 = arith.constant 0 : i32
    return %c0_i32, %c0_i32_0 : i32, i32
  }
}

module attributes {stable_mosaic.version = 11 : i64} {
  func.func @_forward_from_x_kernel(%arg0: i32, %arg1: memref<16x128xbf16, #tpu.memory_space<vmem>>, %arg2: memref<128x512xbf16, #tpu.memory_space<vmem>>, %arg3: memref<1x512xf32, #tpu.memory_space<vmem>>, %arg4: memref<1x512xf32, #tpu.memory_space<vmem>>, %arg5: memref<1x512xf32, #tpu.memory_space<vmem>>, %arg6: memref<512x256xbf16, #tpu.memory_space<vmem>>, %arg7: memref<1x256xf32, #tpu.memory_space<vmem>>, %arg8: memref<256x128xbf16, #tpu.memory_space<vmem>>, %arg9: memref<1x128xf32, #tpu.memory_space<vmem>>, %arg10: memref<128x128xbf16, #tpu.memory_space<vmem>>, %arg11: memref<1x128xf32, #tpu.memory_space<vmem>>, %arg12: memref<16x128xbf16, #tpu.memory_space<vmem>>) attributes {dimension_semantics = [#tpu.dimension_semantics<parallel>], iteration_bounds = array<i64: 1>, scalar_prefetch = 0 : i64, scratch_operands = 0 : i64, tpu.core_type = #tpu.core_type<tc>, window_params = [{transform_indices = @transform_0, window_bounds = array<i64: 16, 128>}, {pipeline_mode = #tpu.pipeline_mode<synchronous>, transform_indices = @transform_1, window_bounds = array<i64: 128, 512>}, {pipeline_mode = #tpu.pipeline_mode<synchronous>, transform_indices = @transform_2, window_bounds = array<i64: 1, 512>}, {pipeline_mode = #tpu.pipeline_mode<synchronous>, transform_indices = @transform_3, window_bounds = array<i64: 1, 512>}, {pipeline_mode = #tpu.pipeline_mode<synchronous>, transform_indices = @transform_4, window_bounds = array<i64: 1, 512>}, {pipeline_mode = #tpu.pipeline_mode<synchronous>, transform_indices = @transform_5, window_bounds = array<i64: 512, 256>}, {pipeline_mode = #tpu.pipeline_mode<synchronous>, transform_indices = @transform_6, window_bounds = array<i64: 1, 256>}, {pipeline_mode = #tpu.pipeline_mode<synchronous>, transform_indices = @transform_7, window_bounds = array<i64: 256, 128>}, {pipeline_mode = #tpu.pipeline_mode<synchronous>, transform_indices = @transform_8, window_bounds = array<i64: 1, 128>}, {pipeline_mode = #tpu.pipeline_mode<synchronous>, transform_indices = @transform_9, window_bounds = array<i64: 128, 128>}, {pipeline_mode = #tpu.pipeline_mode<synchronous>, transform_indices = @transform_10, window_bounds = array<i64: 1, 128>}, {transform_indices = @transform_11, window_bounds = array<i64: 16, 128>}]} {
    %c0 = arith.constant 0 : index
    %c0_0 = arith.constant 0 : index
    %0 = vector.load %arg1[%c0, %c0_0] : memref<16x128xbf16, #tpu.memory_space<vmem>>, vector<16x128xbf16>
    %c0_1 = arith.constant 0 : index
    %c0_2 = arith.constant 0 : index
    %1 = vector.load %arg2[%c0_1, %c0_2] : memref<128x512xbf16, #tpu.memory_space<vmem>>, vector<128x512xbf16>
    %cst = arith.constant dense<0.000000e+00> : vector<16x512xf32>
    %2 = tpu.matmul %0, %1, %cst {dimension_numbers = #tpu.dot_dimension_numbers<[1], [0], [0], [1], [0, 0, 1, 1], [], []>} : vector<16x128xbf16>, vector<128x512xbf16>, vector<16x512xf32> -> vector<16x512xf32>
    %c0_3 = arith.constant 0 : index
    %c0_4 = arith.constant 0 : index
    %3 = vector.load %arg3[%c0_3, %c0_4] : memref<1x512xf32, #tpu.memory_space<vmem>>, vector<1x512xf32>
    %4 = vector.broadcast %3 : vector<1x512xf32> to vector<16x512xf32>
    %5 = arith.addf %2, %4 : vector<16x512xf32>
    %c0_5 = arith.constant 0 : index
    %c0_6 = arith.constant 0 : index
    %6 = vector.load %arg4[%c0_5, %c0_6] : memref<1x512xf32, #tpu.memory_space<vmem>>, vector<1x512xf32>
    %7 = vector.broadcast %6 : vector<1x512xf32> to vector<16x512xf32>
    %8 = arith.mulf %5, %7 : vector<16x512xf32>
    %c0_7 = arith.constant 0 : index
    %c0_8 = arith.constant 0 : index
    %9 = vector.load %arg5[%c0_7, %c0_8] : memref<1x512xf32, #tpu.memory_space<vmem>>, vector<1x512xf32>
    %10 = vector.broadcast %9 : vector<1x512xf32> to vector<16x512xf32>
    %11 = arith.addf %8, %10 : vector<16x512xf32>
    %cst_9 = arith.constant 0.000000e+00 : f32
    %12 = vector.broadcast %cst_9 : f32 to vector<16x512xf32>
    %13 = arith.maximumf %11, %12 : vector<16x512xf32>
    %14 = arith.truncf %13 : vector<16x512xf32> to vector<16x512xbf16>
    %c0_10 = arith.constant 0 : index
    %c0_11 = arith.constant 0 : index
    %15 = vector.load %arg6[%c0_10, %c0_11] : memref<512x256xbf16, #tpu.memory_space<vmem>>, vector<512x256xbf16>
    %cst_12 = arith.constant dense<0.000000e+00> : vector<16x256xf32>
    %16 = tpu.matmul %14, %15, %cst_12 {dimension_numbers = #tpu.dot_dimension_numbers<[1], [0], [0], [1], [0, 0, 1, 1], [], []>} : vector<16x512xbf16>, vector<512x256xbf16>, vector<16x256xf32> -> vector<16x256xf32>
    %c0_13 = arith.constant 0 : index
    %c0_14 = arith.constant 0 : index
    %17 = vector.load %arg7[%c0_13, %c0_14] : memref<1x256xf32, #tpu.memory_space<vmem>>, vector<1x256xf32>
    %18 = vector.broadcast %17 : vector<1x256xf32> to vector<16x256xf32>
    %19 = arith.addf %16, %18 : vector<16x256xf32>
    %cst_15 = arith.constant 0.000000e+00 : f32
    %20 = vector.broadcast %cst_15 : f32 to vector<16x256xf32>
    %21 = arith.maximumf %19, %20 : vector<16x256xf32>
    %22 = arith.truncf %21 : vector<16x256xf32> to vector<16x256xbf16>
    %c0_16 = arith.constant 0 : index
    %c0_17 = arith.constant 0 : index
    %23 = vector.load %arg8[%c0_16, %c0_17] : memref<256x128xbf16, #tpu.memory_space<vmem>>, vector<256x128xbf16>
    %cst_18 = arith.constant dense<0.000000e+00> : vector<16x128xf32>
    %24 = tpu.matmul %22, %23, %cst_18 {dimension_numbers = #tpu.dot_dimension_numbers<[1], [0], [0], [1], [0, 0, 1, 1], [], []>} : vector<16x256xbf16>, vector<256x128xbf16>, vector<16x128xf32> -> vector<16x128xf32>
    %c0_19 = arith.constant 0 : index
    %c0_20 = arith.constant 0 : index
    %25 = vector.load %arg9[%c0_19, %c0_20] : memref<1x128xf32, #tpu.memory_space<vmem>>, vector<1x128xf32>
    %26 = vector.broadcast %25 : vector<1x128xf32> to vector<16x128xf32>
    %27 = arith.addf %24, %26 : vector<16x128xf32>
    %cst_21 = arith.constant 0.000000e+00 : f32
    %28 = vector.broadcast %cst_21 : f32 to vector<16x128xf32>
    %29 = arith.maximumf %27, %28 : vector<16x128xf32>
    %30 = arith.truncf %29 : vector<16x128xf32> to vector<16x128xbf16>
    %c0_22 = arith.constant 0 : index
    %c0_23 = arith.constant 0 : index
    %31 = vector.load %arg10[%c0_22, %c0_23] : memref<128x128xbf16, #tpu.memory_space<vmem>>, vector<128x128xbf16>
    %cst_24 = arith.constant dense<0.000000e+00> : vector<16x128xf32>
    %32 = tpu.matmul %30, %31, %cst_24 {dimension_numbers = #tpu.dot_dimension_numbers<[1], [0], [0], [1], [0, 0, 1, 1], [], []>} : vector<16x128xbf16>, vector<128x128xbf16>, vector<16x128xf32> -> vector<16x128xf32>
    %c0_25 = arith.constant 0 : index
    %c0_26 = arith.constant 0 : index
    %33 = vector.load %arg11[%c0_25, %c0_26] : memref<1x128xf32, #tpu.memory_space<vmem>>, vector<1x128xf32>
    %34 = vector.broadcast %33 : vector<1x128xf32> to vector<16x128xf32>
    %35 = arith.addf %32, %34 : vector<16x128xf32>
    %36 = arith.truncf %35 : vector<16x128xf32> to vector<16x128xbf16>
    %c0_27 = arith.constant 0 : index
    %c0_28 = arith.constant 0 : index
    %37 = vector.load %arg12[%c0_27, %c0_28] : memref<16x128xbf16, #tpu.memory_space<vmem>>, vector<16x128xbf16>
    tpu.vector_store %arg12[%c0_27, %c0_28], %36 {strides = array<i32>} : memref<16x128xbf16, #tpu.memory_space<vmem>>, vector<16x128xbf16>,
    return
  }
  func.func @transform_0(%arg0: i32) -> (i32, i32) {
    %c0_i32 = arith.constant 0 : i32
    %c0_i32_0 = arith.constant 0 : i32
    return %arg0, %c0_i32 : i32, i32
  }
  func.func @transform_1(%arg0: i32) -> (i32, i32) {
    %c0_i32 = arith.constant 0 : i32
    %c0_i32_0 = arith.constant 0 : i32
    %c0_i32_1 = arith.constant 0 : i32
    return %c0_i32, %c0_i32_0 : i32, i32
  }
  func.func @transform_2(%arg0: i32) -> (i32, i32) {
    %c0_i32 = arith.constant 0 : i32
    %c0_i32_0 = arith.constant 0 : i32
    %c0_i32_1 = arith.constant 0 : i32
    return %c0_i32, %c0_i32_0 : i32, i32
  }
  func.func @transform_3(%arg0: i32) -> (i32, i32) {
    %c0_i32 = arith.constant 0 : i32
    %c0_i32_0 = arith.constant 0 : i32
    %c0_i32_1 = arith.constant 0 : i32
    return %c0_i32, %c0_i32_0 : i32, i32
  }
  func.func @transform_4(%arg0: i32) -> (i32, i32) {
    %c0_i32 = arith.constant 0 : i32
    %c0_i32_0 = arith.constant 0 : i32
    %c0_i32_1 = arith.constant 0 : i32
    return %c0_i32, %c0_i32_0 : i32, i32
  }
  func.func @transform_5(%arg0: i32) -> (i32, i32) {
    %c0_i32 = arith.constant 0 : i32
    %c0_i32_0 = arith.constant 0 : i32
    %c0_i32_1 = arith.constant 0 : i32
    return %c0_i32, %c0_i32_0 : i32, i32
  }
  func.func @transform_6(%arg0: i32) -> (i32, i32) {
    %c0_i32 = arith.constant 0 : i32
    %c0_i32_0 = arith.constant 0 : i32
    %c0_i32_1 = arith.constant 0 : i32
    return %c0_i32, %c0_i32_0 : i32, i32
  }
  func.func @transform_7(%arg0: i32) -> (i32, i32) {
    %c0_i32 = arith.constant 0 : i32
    %c0_i32_0 = arith.constant 0 : i32
    %c0_i32_1 = arith.constant 0 : i32
    return %c0_i32, %c0_i32_0 : i32, i32
  }
  func.func @transform_8(%arg0: i32) -> (i32, i32) {
    %c0_i32 = arith.constant 0 : i32
    %c0_i32_0 = arith.constant 0 : i32
    %c0_i32_1 = arith.constant 0 : i32
    return %c0_i32, %c0_i32_0 : i32, i32
  }
  func.func @transform_9(%arg0: i32) -> (i32, i32) {
    %c0_i32 = arith.constant 0 : i32
    %c0_i32_0 = arith.constant 0 : i32
    %c0_i32_1 = arith.constant 0 : i32
    return %c0_i32, %c0_i32_0 : i32, i32
  }
  func.func @transform_10(%arg0: i32) -> (i32, i32) {
    %c0_i32 = arith.constant 0 : i32
    %c0_i32_0 = arith.constant 0 : i32
    %c0_i32_1 = arith.constant 0 : i32
    return %c0_i32, %c0_i32_0 : i32, i32
  }
  func.func @transform_11(%arg0: i32) -> (i32, i32) {
    %c0_i32 = arith.constant 0 : i32
    %c0_i32_0 = arith.constant 0 : i32
    return %arg0, %c0_i32 : i32, i32
  }
}

</mosaic_0001>

<bundles_post_ra>
// kernel: encoder_csf.2
= control target key start
LH: loop header
LB: loop body
LE: loop exit
PB: predicated region body
PF: predicated region fallthrough
CT: control target
= control target key end

     0   :  { %v535_v1 = vmov 0   ;;  %v18_v34 = vlaneseq  ;;  %v536_v36 = vmov 0.0   ;;  %v537_v37 = vmov 1966171168   ;;  %s695_s1 = inlined_call_operand.vmem [shape: bf16[128,512], index: 1, kind: input, shape index: {}]   ;;  %s696_s0 = inlined_call_operand.vmem [shape: bf16[16,128], index: 0, kind: input, shape index: {}]   ;;  %s697_s2 = inlined_call_operand.vmem [shape: f32[1,512], index: 2, kind: output, shape index: {0}]   ;;  %s698_s3 = inlined_call_operand.vmem [shape: f32[1,512], index: 3, kind: output, shape index: {1}]  }
   0x1   :  { %v486_v0 = vld [vmem:[%s695_s1 + $0x4] ss:$16 sps:$4 sm:$0xff]   ;;  %256 = vmatprep.mubr.bf16.mxu0 %v535_v1  ;;  %299 = vmatprep.mubr.bf16.mxu1 %v535_v1  ;;  %v488_v2 = vld [vmem:[%s695_s1 + $0xc] ss:$16 sps:$4 sm:$0xff]   ;;  %v490_v3 = vld [vmem:[%s695_s1] ss:$16 sps:$4 sm:$0xff]   ;;  %v346_v38 = vunpack.c.l.s4 %v537_v37 }
   0x2   :  { %224 = vmatprep.subr.bf16.mxu0 %v486_v0  ;;  %v491_v4 = vld [vmem:[%s695_s1 + $0x8] ss:$16 sps:$4 sm:$0xff]   ;;  %267 = vmatprep.subr.bf16.mxu1 %v488_v2  ;;  %v492_v5 = vld [vmem:[%s695_s1 + $0x24] ss:$16 sps:$4 sm:$0xff]   ;;  %v494_v6 = vld [vmem:[%s695_s1 + $0x2c] ss:$16 sps:$4 sm:$0xff]  }
   0x3   :  { %225 = vmatpush1.bf16.msra.mxu0 %v490_v3  ;;  %268 = vmatpush1.bf16.msra.mxu1 %v491_v4  ;;  %v496_v7 = vld [vmem:[%s695_s1 + $0x20] ss:$16 sps:$4 sm:$0xff]   ;;  %v497_v8 = vld [vmem:[%s695_s1 + $0x28] ss:$16 sps:$4 sm:$0xff]   ;;  %v498_v9 = vld [vmem:[%s695_s1 + $0x44] ss:$16 sps:$4 sm:$0xff]   ;;  %v347_v39 = vunpack.c.0.s8 %v346_v38 }
   0x4   :  { %226 = vmatprep.subr.bf16.mxu0 %v492_v5  ;;  %269 = vmatprep.subr.bf16.mxu1 %v494_v6  ;;  %v500_v10 = vld [vmem:[%s695_s1 + $0x4c] ss:$16 sps:$4 sm:$0xff]   ;;  %v502_v11 = vld [vmem:[%s695_s1 + $0x40] ss:$16 sps:$4 sm:$0xff]   ;;  %v503_v12 = vld [vmem:[%s695_s1 + $0x48] ss:$16 sps:$4 sm:$0xff]  }
   0x5   :  { %v504_v13 = vld [vmem:[%s695_s1 + $0x64] ss:$16 sps:$4 sm:$0xff]   ;;  %v506_v14 = vld [vmem:[%s695_s1 + $0x6c] ss:$16 sps:$4 sm:$0xff]   ;;  %v508_v15 = vld [vmem:[%s695_s1 + $0x60] ss:$16 sps:$4 sm:$0xff]  }
   0x6   :  { %v509_v16 = vld [vmem:[%s695_s1 + $0x68] ss:$16 sps:$4 sm:$0xff]   ;;  %v510_v17 = vld [vmem:[%s695_s1 + $0x84] ss:$16 sps:$4 sm:$0xff]   ;;  %v512_v18 = vld [vmem:[%s695_s1 + $0x8c] ss:$16 sps:$4 sm:$0xff]  }
   0x7   :  { %227 = vmatpush1.bf16.msra.mxu0 %v496_v7  ;;  %270 = vmatpush1.bf16.msra.mxu1 %v497_v8  ;;  %v514_v19 = vld [vmem:[%s695_s1 + $0x80] ss:$16 sps:$4 sm:$0xff]   ;;  %v515_v20 = vld [vmem:[%s695_s1 + $0x88] ss:$16 sps:$4 sm:$0xff]   ;;  %v516_v21 = vld [vmem:[%s695_s1 + $0xa4] ss:$16 sps:$4 sm:$0xff]  }
   0x8   :  { %228 = vmatprep.subr.bf16.mxu0 %v498_v9  ;;  %271 = vmatprep.subr.bf16.mxu1 %v500_v10  ;;  %v518_v22 = vld [vmem:[%s695_s1 + $0xac] ss:$16 sps:$4 sm:$0xff]   ;;  %v520_v23 = vld [vmem:[%s695_s1 + $0xa0] ss:$16 sps:$4 sm:$0xff]   ;;  %v521_v24 = vld [vmem:[%s695_s1 + $0xa8] ss:$16 sps:$4 sm:$0xff]  }
   0x9   :  { %v522_v25 = vld [vmem:[%s695_s1 + $0xc4] ss:$16 sps:$4 sm:$0xff]   ;;  %v524_v26 = vld [vmem:[%s695_s1 + $0xcc] ss:$16 sps:$4 sm:$0xff]   ;;  %v526_v27 = vld [vmem:[%s695_s1 + $0xc0] ss:$16 sps:$4 sm:$0xff]  }
   0xa   :  { %v527_v28 = vld [vmem:[%s695_s1 + $0xc8] ss:$16 sps:$4 sm:$0xff]   ;;  %v528_v29 = vld [vmem:[%s695_s1 + $0xe4] ss:$16 sps:$4 sm:$0xff]   ;;  %v530_v30 = vld [vmem:[%s695_s1 + $0xec] ss:$16 sps:$4 sm:$0xff]  }
   0xb   :  { %229 = vmatpush1.bf16.msra.mxu0 %v502_v11  ;;  %272 = vmatpush1.bf16.msra.mxu1 %v503_v12  ;;  %v532_v31 = vld [vmem:[%s695_s1 + $0xe0] ss:$16 sps:$4 sm:$0xff]   ;;  %v533_v32 = vld [vmem:[%s695_s1 + $0xe8] ss:$16 sps:$4 sm:$0xff]   ;;  %vm657_vm0 = vcmp.lt.s32.totalorder %v18_v34, 512  ;;  %v349_v40 = vshrl.u32 %v18_v34, 7 }
   0xc   :  { %230 = vmatprep.subr.bf16.mxu0 %v504_v13  ;;  %273 = vmatprep.subr.bf16.mxu1 %v506_v14  ;;  %v534_v33 = vld [vmem:[%s696_s0] sm:$0xff]   ;;  %22 = vst.msk [vmem:[%s697_s2] sm:$0xf] %vm657_vm0, %v536_v36  ;;  %23 = vst.msk [vmem:[%s698_s3] sm:$0xf] %vm657_vm0, %v536_v36 }
   0xd   :  { %v671_v45 = vsub.s32 %v347_v39, %v349_v40 }
   0xf   :  { %231 = vmatpush1.bf16.msra.mxu0 %v508_v15  ;;  %274 = vmatpush1.bf16.msra.mxu1 %v509_v16 }
  0x10   :  { %232 = vmatprep.subr.bf16.mxu0 %v510_v17  ;;  %275 = vmatprep.subr.bf16.mxu1 %v512_v18 }
  0x13   :  { %233 = vmatpush1.bf16.msra.mxu0 %v514_v19  ;;  %276 = vmatpush1.bf16.msra.mxu1 %v515_v20 }
  0x14   :  { %234 = vmatprep.subr.bf16.mxu0 %v516_v21  ;;  %277 = vmatprep.subr.bf16.mxu1 %v518_v22 }
  0x17   :  { %235 = vmatpush1.bf16.msra.mxu0 %v520_v23  ;;  %278 = vmatpush1.bf16.msra.mxu1 %v521_v24 }
  0x18   :  { %236 = vmatprep.subr.bf16.mxu0 %v522_v25  ;;  %279 = vmatprep.subr.bf16.mxu1 %v524_v26 }
  0x1b   :  { %237 = vmatpush1.bf16.msra.mxu0 %v526_v27  ;;  %280 = vmatpush1.bf16.msra.mxu1 %v527_v28 }
  0x1c   :  { %238 = vmatprep.subr.bf16.mxu0 %v528_v29  ;;  %281 = vmatprep.subr.bf16.mxu1 %v530_v30 }
  0x1f   :  { %239 = vmatpush1.bf16.msra.mxu0 %v532_v31  ;;  %282 = vmatpush1.bf16.msra.mxu1 %v533_v32 }
  0x22   :  { %257 = vmatmul.mubr.bf16.vlgmr.msra.gmra.mrb[0].mxu0 %v534_v33  ;;  %300 = vmatmul.mubr.bf16.vlgmr.msra.gmra.mrb[0].mxu1 %v534_v33 }
  0xf5   :  { %v258_v41 = vpop.f32.mrb[0].mxu0  ;;  %v301_v42 = vpop.f32.mrb[0].mxu1 }
  0xf6   :  { %v260_v43 = vpop.f32.mrb[1].mxu0  ;;  %v303_v44 = vpop.f32.mrb[1].mxu1  ;;  %v375_v46 = vmul.f32 %v258_v41, %v258_v41  ;;  %v377_v47 = vmul.f32 %v301_v42, %v301_v42 }
  0xf7   :  { %v376_v48 = vmul.f32 %v260_v43, %v260_v43  ;;  %v378_v49 = vmul.f32 %v303_v44, %v303_v44  ;;  %v262_v50 = vpop.f32.mrb[2].mxu0  ;;  %v305_v51 = vpop.f32.mrb[2].mxu1 }
  0xf8   :  { %v311_v52 = vadd.f32 %v262_v50, %v258_v41  ;;  %v379_v53 = vmul.f32 %v262_v50, %v262_v50  ;;  %v325_v54 = vadd.f32 %v305_v51, %v301_v42  ;;  %v381_v55 = vmul.f32 %v305_v51, %v305_v51  ;;  %v264_v56 = vpop.f32.mrb[3].mxu0  ;;  %v307_v57 = vpop.f32.mrb[3].mxu1 }
  0xf9   :  { %v318_v58 = vadd.f32 %v264_v56, %v260_v43  ;;  %v380_v59 = vmul.f32 %v264_v56, %v264_v56  ;;  %v332_v60 = vadd.f32 %v307_v57, %v303_v44  ;;  %v382_v61 = vmul.f32 %v307_v57, %v307_v57 }
  0xfa   :  { %v312_v62 = vrot.slane %v311_v52, 4  ;;  %v383_v63 = vadd.f32 %v379_v53, %v375_v46  ;;  %v326_v0 = vrot.slane %v325_v54, 4  ;;  %v397_v1 = vadd.f32 %v381_v55, %v377_v47 }
  0xfb   :  { %v319_v2 = vrot.slane %v318_v58, 4  ;;  %v390_v3 = vadd.f32 %v380_v59, %v376_v48  ;;  %v333_v4 = vrot.slane %v332_v60, 4  ;;  %v404_v5 = vadd.f32 %v382_v61, %v378_v49  ;;  %v310_v61 = vld [vmem:[%s697_s2] sm:$0xf] }
  0xfc   :  { %v313_v6 = vadd.f32 %v312_v62, %v311_v52  ;;  %v384_v7 = vrot.slane %v383_v63, 4  ;;  %v327_v8 = vadd.f32 %v326_v0, %v325_v54  ;;  %v398_v9 = vrot.slane %v397_v1, 4  ;;  %v374_v0 = vld [vmem:[%s698_s3] sm:$0xf] }
  0xfd   :  { %v320_v10 = vadd.f32 %v319_v2, %v318_v58  ;;  %v391_v11 = vrot.slane %v390_v3, 4  ;;  %v334_v12 = vadd.f32 %v333_v4, %v332_v60  ;;  %v405_v13 = vrot.slane %v404_v5, 4 }
  0xfe   :  { %v314_v14 = vrot.slane %v313_v6, 2  ;;  %v385_v15 = vadd.f32 %v384_v7, %v383_v63  ;;  %v328_v16 = vrot.slane %v327_v8, 2  ;;  %v399_v17 = vadd.f32 %v398_v9, %v397_v1 }
  0xff   :  { %v321_v18 = vrot.slane %v320_v10, 2  ;;  %v392_v19 = vadd.f32 %v391_v11, %v390_v3  ;;  %v335_v20 = vrot.slane %v334_v12, 2  ;;  %v406_v21 = vadd.f32 %v405_v13, %v404_v5 }
 0x100   :  { %v315_v22 = vadd.f32 %v314_v14, %v313_v6  ;;  %v386_v23 = vrot.slane %v385_v15, 2  ;;  %v329_v24 = vadd.f32 %v328_v16, %v327_v8  ;;  %v400_v25 = vrot.slane %v399_v17, 2 }
 0x101   :  { %v322_v26 = vadd.f32 %v321_v18, %v320_v10  ;;  %v393_v27 = vrot.slane %v392_v19, 2  ;;  %v336_v28 = vadd.f32 %v335_v20, %v334_v12  ;;  %v407_v29 = vrot.slane %v406_v21, 2 }
 0x102   :  { %v316_v30 = vrot.slane %v315_v22, 1  ;;  %v387_v31 = vadd.f32 %v386_v23, %v385_v15  ;;  %v330_v32 = vrot.slane %v329_v24, 1  ;;  %v401_v33 = vadd.f32 %v400_v25, %v399_v17 }
 0x103   :  { %v323_v34 = vrot.slane %v322_v26, 1  ;;  %v394_v36 = vadd.f32 %v393_v27, %v392_v19  ;;  %v337_v37 = vrot.slane %v336_v28, 1  ;;  %v408_v38 = vadd.f32 %v407_v29, %v406_v21 }
 0x104   :  { %v317_v39 = vadd.f32 %v316_v30, %v315_v22  ;;  %v388_v40 = vrot.slane %v387_v31, 1  ;;  %v331_v41 = vadd.f32 %v330_v32, %v329_v24  ;;  %v402_v42 = vrot.slane %v401_v33, 1 }
 0x105   :  { %v324_v43 = vadd.f32 %v323_v34, %v322_v26  ;;  %v395_v44 = vrot.slane %v394_v36, 1  ;;  %v338_v46 = vadd.f32 %v337_v37, %v336_v28  ;;  %v409_v47 = vrot.slane %v408_v38, 1 }
 0x106   :  { %v389_v48 = vadd.f32 %v388_v40, %v387_v31  ;;  %v403_v49 = vadd.f32 %v402_v42, %v401_v33 }
 0x107   :  { %v343_v50 = vcombine.low %v317_v39, %v324_v43  ;;  %v396_v51 = vadd.f32 %v395_v44, %v394_v36  ;;  %v344_v52 = vcombine.low %v331_v41, %v338_v46  ;;  %v410_v53 = vadd.f32 %v409_v47, %v408_v38 }
 0x109   :  { %v351_v54 = vrot.slane %v343_v50, %v671_v45  ;;  %v415_v55 = vcombine.low %v389_v48, %v396_v51  ;;  %v358_v56 = vrot.slane %v344_v52, %v671_v45  ;;  %v416_v57 = vcombine.low %v403_v49, %v410_v53 }
 0x10b   :  { %v423_v58 = vrot.slane %v415_v55, %v671_v45  ;;  %v359_v59 = vcombine.low %v351_v54, %v358_v56  ;;  %v430_v60 = vrot.slane %v416_v57, %v671_v45 }
 0x10d   :  { %v366_v62 = vrot.slane %v359_v59, %v671_v45  ;;  %v431_v63 = vcombine.low %v423_v58, %v430_v60 }
 0x10f   :  { %v368_v1 = vadd.f32 %v366_v62, %v310_v61  ;;  %v438_v2 = vrot.slane %v431_v63, %v671_v45 }
 0x111   :  { %373 = vst.msk [vmem:[%s697_s2] sm:$0xf] %vm657_vm0, %v368_v1  ;;  %v440_v3 = vadd.f32 %v438_v2, %v374_v0 }
 0x113   :  { %441 = vst.msk [vmem:[%s698_s3] sm:$0xf] %vm657_vm0, %v440_v3 }

// kernel: encoder_csf.3
= control target key start
LH: loop header
LB: loop body
LE: loop exit
PB: predicated region body
PF: predicated region fallthrough
CT: control target
= control target key end

     0   :  { %v1575_v1 = vmov 0   ;;  %vm1577_vm0 = vmmov 0   ;;  %s2044_s1 = inlined_call_operand.vmem [shape: bf16[128,512], index: 1, kind: input, shape index: {}]   ;;  %s2045_s0 = inlined_call_operand.vmem [shape: bf16[16,128], index: 0, kind: input, shape index: {}]   ;;  %s2046_s5 = inlined_call_operand.vmem [shape: bf16[512,256], index: 5, kind: input, shape index: {}]   ;;  %s2047_s7 = inlined_call_operand.vmem [shape: bf16[256,128], index: 7, kind: input, shape index: {}]   ;;  %s2048_s2 = inlined_call_operand.vmem [shape: f32[1,512], index: 2, kind: input, shape index: {}]   ;;  %s2049_s3 = inlined_call_operand.vmem [shape: f32[1,512], index: 3, kind: input, shape index: {}]   ;;  %s2050_s4 = inlined_call_operand.vmem [shape: f32[1,512], index: 4, kind: input, shape index: {}]   ;;  %s2051_s9 = inlined_call_operand.vmem [shape: bf16[128,128], index: 9, kind: input, shape index: {}]   ;;  %s2052_s6 = inlined_call_operand.vmem [shape: f32[1,256], index: 6, kind: input, shape index: {}]   ;;  %s2053_s8 = inlined_call_operand.vmem [shape: f32[1,128], index: 8, kind: input, shape index: {}]   ;;  %s2054_s10 = inlined_call_operand.vmem [shape: f32[1,128], index: 10, kind: input, shape index: {}]   ;;  %s2055_s11 = inlined_call_operand.vmem [shape: bf16[16,128], index: 11, kind: output, shape index: {}]  }
   0x1   :  { %v1406_v0 = vld [vmem:[%s2044_s1 + $0x4] ss:$16 sps:$4 sm:$0xff]   ;;  %293 = vmatprep.mubr.bf16.mxu1 %v1575_v1  ;;  %v1408_v2 = vld [vmem:[%s2044_s1] ss:$16 sps:$4 sm:$0xff]   ;;  %v1433_v22 = vld [vmem:[%s2044_s1 + $0xc] ss:$16 sps:$4 sm:$0xff]  }
   0x2   :  { %261 = vmatprep.subr.bf16.mxu1 %v1406_v0  ;;  %v1409_v3 = vld [vmem:[%s2044_s1 + $0x24] ss:$16 sps:$4 sm:$0xff]   ;;  %v1411_v4 = vld [vmem:[%s2044_s1 + $0x20] ss:$16 sps:$4 sm:$0xff]   ;;  %v1431_v25 = vld [vmem:[%s2044_s1 + $0x8] ss:$16 sps:$4 sm:$0xff]  }
   0x3   :  { %262 = vmatpush1.bf16.msra.mxu1 %v1408_v2  ;;  %v1412_v5 = vld [vmem:[%s2044_s1 + $0x44] ss:$16 sps:$4 sm:$0xff]   ;;  %v1414_v6 = vld [vmem:[%s2044_s1 + $0x40] ss:$16 sps:$4 sm:$0xff]   ;;  %v1436_v26 = vld [vmem:[%s2044_s1 + $0x2c] ss:$16 sps:$4 sm:$0xff]  }
   0x4   :  { %263 = vmatprep.subr.bf16.mxu1 %v1409_v3  ;;  %v1415_v7 = vld [vmem:[%s2044_s1 + $0x64] ss:$16 sps:$4 sm:$0xff]   ;;  %v1417_v8 = vld [vmem:[%s2044_s1 + $0x60] ss:$16 sps:$4 sm:$0xff]   ;;  %v1434_v29 = vld [vmem:[%s2044_s1 + $0x28] ss:$16 sps:$4 sm:$0xff]  }
   0x5   :  { %v1418_v9 = vld [vmem:[%s2044_s1 + $0x84] ss:$16 sps:$4 sm:$0xff]   ;;  %v1420_v10 = vld [vmem:[%s2044_s1 + $0x80] ss:$16 sps:$4 sm:$0xff]   ;;  %v1439_v31 = vld [vmem:[%s2044_s1 + $0x4c] ss:$16 sps:$4 sm:$0xff]  }
   0x6   :  { %v1421_v11 = vld [vmem:[%s2044_s1 + $0xa4] ss:$16 sps:$4 sm:$0xff]   ;;  %v1423_v12 = vld [vmem:[%s2044_s1 + $0xa0] ss:$16 sps:$4 sm:$0xff]   ;;  %v1437_v33 = vld [vmem:[%s2044_s1 + $0x48] ss:$16 sps:$4 sm:$0xff]  }
   0x7   :  { %264 = vmatpush1.bf16.msra.mxu1 %v1411_v4  ;;  %v1424_v13 = vld [vmem:[%s2044_s1 + $0xc4] ss:$16 sps:$4 sm:$0xff]   ;;  %v1426_v14 = vld [vmem:[%s2044_s1 + $0xc0] ss:$16 sps:$4 sm:$0xff]   ;;  %v1442_v34 = vld [vmem:[%s2044_s1 + $0x6c] ss:$16 sps:$4 sm:$0xff]  }
   0x8   :  { %265 = vmatprep.subr.bf16.mxu1 %v1412_v5  ;;  %v1455_v15 = vld [vmem:[%s2046_s5 + $0x4] ss:$8 sps:$4 sm:$0xff]   ;;  %v1457_v16 = vld [vmem:[%s2046_s5] ss:$8 sps:$4 sm:$0xff]   ;;  %v1458_v18 = vld [vmem:[%s2046_s5 + $0x14] ss:$8 sps:$4 sm:$0xff]  }
   0x9   :  { %v1427_v17 = vld [vmem:[%s2044_s1 + $0xe4] ss:$16 sps:$4 sm:$0xff]   ;;  %815 = vmatprep.subr.bf16.mxu0 %v1455_v15  ;;  %v1460_v19 = vld [vmem:[%s2046_s5 + $0x10] ss:$8 sps:$4 sm:$0xff]   ;;  %v1463_v24 = vld [vmem:[%s2046_s5 + $0x20] ss:$8 sps:$4 sm:$0xff]  }
   0xa   :  { %816 = vmatpush1.bf16.msra.mxu0 %v1457_v16  ;;  %v1429_v20 = vld [vmem:[%s2044_s1 + $0xe0] ss:$16 sps:$4 sm:$0xff]   ;;  %v1461_v21 = vld [vmem:[%s2046_s5 + $0x24] ss:$8 sps:$4 sm:$0xff]   ;;  %v1464_v27 = vld [vmem:[%s2046_s5 + $0x34] ss:$8 sps:$4 sm:$0xff]  }
   0xb   :  { %266 = vmatpush1.bf16.msra.mxu1 %v1414_v6  ;;  %817 = vmatprep.subr.bf16.mxu0 %v1458_v18  ;;  %v1707_v23 = vld [vmem:[%s2045_s0] sm:$0xff]   ;;  %v1466_v28 = vld [vmem:[%s2046_s5 + $0x30] ss:$8 sps:$4 sm:$0xff]   ;;  %v1470_v35 = vld [vmem:[%s2046_s5 + $0x54] ss:$8 sps:$4 sm:$0xff]  }
   0xc   :  { %267 = vmatprep.subr.bf16.mxu1 %v1415_v7  ;;  %v1467_v30 = vld [vmem:[%s2046_s5 + $0x44] ss:$8 sps:$4 sm:$0xff]   ;;  %v1469_v32 = vld [vmem:[%s2046_s5 + $0x40] ss:$8 sps:$4 sm:$0xff]   ;;  %v1472_v36 = vld [vmem:[%s2046_s5 + $0x50] ss:$8 sps:$4 sm:$0xff]  }
   0xd   :  { %v1440_v37 = vld [vmem:[%s2044_s1 + $0x68] ss:$16 sps:$4 sm:$0xff]   ;;  %v1473_v38 = vld [vmem:[%s2046_s5 + $0x64] ss:$8 sps:$4 sm:$0xff]   ;;  %v1476_v42 = vld [vmem:[%s2046_s5 + $0x74] ss:$8 sps:$4 sm:$0xff]  }
   0xe   :  { %818 = vmatpush1.bf16.msra.mxu0 %v1460_v19  ;;  %v1445_v39 = vld [vmem:[%s2044_s1 + $0x8c] ss:$16 sps:$4 sm:$0xff]   ;;  %v1475_v40 = vld [vmem:[%s2046_s5 + $0x60] ss:$8 sps:$4 sm:$0xff]   ;;  %v1478_v44 = vld [vmem:[%s2046_s5 + $0x70] ss:$8 sps:$4 sm:$0xff]  }
   0xf   :  { %268 = vmatpush1.bf16.msra.mxu1 %v1417_v8  ;;  %819 = vmatprep.subr.bf16.mxu0 %v1461_v21  ;;  %v1443_v41 = vld [vmem:[%s2044_s1 + $0x88] ss:$16 sps:$4 sm:$0xff]   ;;  %v1448_v43 = vld [vmem:[%s2044_s1 + $0xac] ss:$16 sps:$4 sm:$0xff]   ;;  %v1551_v3 = vld [vmem:[%s2047_s7 + $0x40] sm:$0xff]  }
  0x10   :  { %269 = vmatprep.subr.bf16.mxu1 %v1418_v9  ;;  %v1446_v45 = vld [vmem:[%s2044_s1 + $0xa8] ss:$16 sps:$4 sm:$0xff]   ;;  %v1479_v46 = vld [vmem:[%s2046_s5 + $0x84] ss:$8 sps:$4 sm:$0xff]   ;;  %v1482_v50 = vld [vmem:[%s2046_s5 + $0x94] ss:$8 sps:$4 sm:$0xff]  }
  0x11   :  { %v1451_v47 = vld [vmem:[%s2044_s1 + $0xcc] ss:$16 sps:$4 sm:$0xff]   ;;  %v1481_v48 = vld [vmem:[%s2046_s5 + $0x80] ss:$8 sps:$4 sm:$0xff]   ;;  %v1484_v52 = vld [vmem:[%s2046_s5 + $0x90] ss:$8 sps:$4 sm:$0xff]  }
  0x12   :  { %820 = vmatpush1.bf16.msra.mxu0 %v1463_v24  ;;  %v1449_v49 = vld [vmem:[%s2044_s1 + $0xc8] ss:$16 sps:$4 sm:$0xff]   ;;  %v1454_v51 = vld [vmem:[%s2044_s1 + $0xec] ss:$16 sps:$4 sm:$0xff]   ;;  %v1552_v4 = vld [vmem:[%s2047_s7] sm:$0xff]  }
  0x13   :  { %270 = vmatpush1.bf16.msra.mxu1 %v1420_v10  ;;  %821 = vmatprep.subr.bf16.mxu0 %v1464_v27  ;;  %v1452_v53 = vld [vmem:[%s2044_s1 + $0xe8] ss:$16 sps:$4 sm:$0xff]   ;;  %v1485_v54 = vld [vmem:[%s2046_s5 + $0xa4] ss:$8 sps:$4 sm:$0xff]   ;;  %v1488_v56 = vld [vmem:[%s2046_s5 + $0xb4] ss:$8 sps:$4 sm:$0xff]  }
  0x14   :  { %271 = vmatprep.subr.bf16.mxu1 %v1421_v11  ;;  %v1487_v55 = vld [vmem:[%s2046_s5 + $0xa0] ss:$8 sps:$4 sm:$0xff]   ;;  %v1490_v57 = vld [vmem:[%s2046_s5 + $0xb0] ss:$8 sps:$4 sm:$0xff]   ;;  %v1491_v58 = vld [vmem:[%s2046_s5 + $0xc4] ss:$8 sps:$4 sm:$0xff]  }
  0x15   :  { %v1493_v59 = vld [vmem:[%s2046_s5 + $0xc0] ss:$8 sps:$4 sm:$0xff]   ;;  %v1494_v60 = vld [vmem:[%s2046_s5 + $0xd4] ss:$8 sps:$4 sm:$0xff]   ;;  %v1496_v61 = vld [vmem:[%s2046_s5 + $0xd0] ss:$8 sps:$4 sm:$0xff]  }
  0x16   :  { %822 = vmatpush1.bf16.msra.mxu0 %v1466_v28  ;;  %v1497_v62 = vld [vmem:[%s2046_s5 + $0xe4] ss:$8 sps:$4 sm:$0xff]   ;;  %v1499_v63 = vld [vmem:[%s2046_s5 + $0xe0] ss:$8 sps:$4 sm:$0xff]   ;;  %v1500_v0 = vld [vmem:[%s2046_s5 + $0xf4] ss:$8 sps:$4 sm:$0xff]  }
  0x17   :  { %272 = vmatpush1.bf16.msra.mxu1 %v1423_v12  ;;  %823 = vmatprep.subr.bf16.mxu0 %v1467_v30  ;;  %v1505_v2 = vld [vmem:[%s2046_s5 + $0x104] ss:$8 sps:$4 sm:$0xff]   ;;  %v1555_v7 = vld [vmem:[%s2047_s7 + $0x50] sm:$0xff]   ;;  %v1557_v9 = vld [vmem:[%s2047_s7 + $0x58] sm:$0xff]  }
  0x18   :  { %273 = vmatprep.subr.bf16.mxu1 %v1424_v13  ;;  %v1553_v5 = vld [vmem:[%s2047_s7 + $0x48] sm:$0xff]   ;;  %v1556_v8 = vld [vmem:[%s2047_s7 + $0x10] sm:$0xff]   ;;  %v1558_v10 = vld [vmem:[%s2047_s7 + $0x18] sm:$0xff]  }
  0x19   :  { %v1554_v6 = vld [vmem:[%s2047_s7 + $0x8] sm:$0xff]   ;;  %v1559_v11 = vld [vmem:[%s2047_s7 + $0x60] sm:$0xff]  }
  0x1a   :  { %824 = vmatpush1.bf16.msra.mxu0 %v1469_v32  ;;  %v1560_v12 = vld [vmem:[%s2047_s7 + $0x20] sm:$0xff]   ;;  %v1561_v13 = vld [vmem:[%s2047_s7 + $0x68] sm:$0xff]  }
  0x1b   :  { %274 = vmatpush1.bf16.msra.mxu1 %v1426_v14  ;;  %825 = vmatprep.subr.bf16.mxu0 %v1470_v35  ;;  %v75_v14 = vlaneseq  ;;  %v347_v19 = vld [vmem:[%s2049_s3] sm:$0xf] }
  0x1c   :  { %275 = vmatprep.subr.bf16.mxu1 %v1427_v17  ;;  %v73_v17 = vld [vmem:[%s2048_s2] sm:$0xf] }
  0x1d   :  { %v76_v15 = vshrl.u32 %v75_v14, 7  ;;  %v1887_v21 = vld [vmem:[%s2050_s4] sm:$0xf] }
  0x1e   :  { %826 = vmatpush1.bf16.msra.mxu0 %v1472_v36 }
  0x1f   :  { %276 = vmatpush1.bf16.msra.mxu1 %v1429_v20  ;;  %827 = vmatprep.subr.bf16.mxu0 %v1473_v38  ;;  %v1873_v16 = vsub.s32 0, %v76_v15  ;;  %v1878_v18 = vsub.s32 1, %v76_v15 }
  0x20   :  { %304 = vmatprep.subr.bf16.mxu1 %v1433_v22 }
  0x21   :  { %v78_v20 = vrot.slane %v73_v17, %v1873_v16  ;;  %v82_v22 = vrot.slane %v73_v17, %v1878_v18  ;;  %v382_v27 = vrot.slane %v1887_v21, %v1873_v16 }
  0x22   :  { %294 = vmatmul.mubr.bf16.vlgmr.msra.gmra.mrb[0].mxu1 %v1707_v23  ;;  %828 = vmatpush1.bf16.msra.mxu0 %v1475_v40 }
  0x23   :  { %305 = vmatpush1.bf16.msra.mxu1 %v1431_v25  ;;  %336 = vmatprep.mubr.bf16.mxu1 %v1575_v1  ;;  %v1502_v1 = vld [vmem:[%s2046_s5 + $0xf0] ss:$8 sps:$4 sm:$0xff]   ;;  %v356_v25 = vrot.slane %v347_v19, %v1878_v18 }
  0x24   :  { %306 = vmatprep.subr.bf16.mxu1 %v1436_v26  ;;  %829 = vmatprep.subr.bf16.mxu0 %v1476_v42 }
  0x26   :  { %830 = vmatpush1.bf16.msra.mxu0 %v1478_v44 }
  0x27   :  { %307 = vmatpush1.bf16.msra.mxu1 %v1434_v29  ;;  %831 = vmatprep.subr.bf16.mxu0 %v1479_v46 }
  0x28   :  { %308 = vmatprep.subr.bf16.mxu1 %v1439_v31  ;;  %v386_v31 = vrot.slane %v1887_v21, %v1878_v18 }
  0x2a   :  { %832 = vmatpush1.bf16.msra.mxu0 %v1481_v48 }
  0x2b   :  { %309 = vmatpush1.bf16.msra.mxu1 %v1437_v33  ;;  %833 = vmatprep.subr.bf16.mxu0 %v1482_v50  ;;  %v1508_v50 = vld [vmem:[%s2046_s5 + $0x114] ss:$8 sps:$4 sm:$0xff]  }
  0x2c   :  { %310 = vmatprep.subr.bf16.mxu1 %v1442_v34 }
  0x2e   :  { %834 = vmatpush1.bf16.msra.mxu0 %v1484_v52  ;;  %v1511_v52 = vld [vmem:[%s2046_s5 + $0x124] ss:$8 sps:$4 sm:$0xff]  }
  0x2f   :  { %311 = vmatpush1.bf16.msra.mxu1 %v1440_v37  ;;  %835 = vmatprep.subr.bf16.mxu0 %v1485_v54  ;;  %v1514_v54 = vld [vmem:[%s2046_s5 + $0x134] ss:$8 sps:$4 sm:$0xff]  }
  0x30   :  { %312 = vmatprep.subr.bf16.mxu1 %v1445_v39 }
  0x32   :  { %836 = vmatpush1.bf16.msra.mxu0 %v1487_v55  ;;  %v1512_v55 = vld [vmem:[%s2046_s5 + $0x130] ss:$8 sps:$4 sm:$0xff]  }
  0x33   :  { %313 = vmatpush1.bf16.msra.mxu1 %v1443_v41  ;;  %837 = vmatprep.subr.bf16.mxu0 %v1488_v56  ;;  %v1517_v56 = vld [vmem:[%s2046_s5 + $0x144] ss:$8 sps:$4 sm:$0xff]  }
  0x34   :  { %314 = vmatprep.subr.bf16.mxu1 %v1448_v43 }
  0x36   :  { %838 = vmatpush1.bf16.msra.mxu0 %v1490_v57  ;;  %v85_v57 = vsub.s32 2, %v76_v15 }
  0x37   :  { %315 = vmatpush1.bf16.msra.mxu1 %v1446_v45  ;;  %839 = vmatprep.subr.bf16.mxu0 %v1491_v58  ;;  %v89_v58 = vsub.s32 3, %v76_v15 }
  0x38   :  { %316 = vmatprep.subr.bf16.mxu1 %v1451_v47 }
  0x3a   :  { %840 = vmatpush1.bf16.msra.mxu0 %v1493_v59  ;;  %v1515_v59 = vld [vmem:[%s2046_s5 + $0x140] ss:$8 sps:$4 sm:$0xff]  }
  0x3b   :  { %317 = vmatpush1.bf16.msra.mxu1 %v1449_v49  ;;  %841 = vmatprep.subr.bf16.mxu0 %v1494_v60  ;;  %v1503_v49 = vld [vmem:[%s2046_s5 + $0x100] ss:$8 sps:$4 sm:$0xff]   ;;  %v1520_v60 = vld [vmem:[%s2046_s5 + $0x154] ss:$8 sps:$4 sm:$0xff]  }
  0x3c   :  { %318 = vmatprep.subr.bf16.mxu1 %v1454_v51  ;;  %v1506_v51 = vld [vmem:[%s2046_s5 + $0x110] ss:$8 sps:$4 sm:$0xff]  }
  0x3e   :  { %842 = vmatpush1.bf16.msra.mxu0 %v1496_v61  ;;  %v86_v61 = vrot.slane %v73_v17, %v85_v57 }
  0x3f   :  { %319 = vmatpush1.bf16.msra.mxu1 %v1452_v53  ;;  %843 = vmatprep.subr.bf16.mxu0 %v1497_v62  ;;  %v1509_v53 = vld [vmem:[%s2046_s5 + $0x120] ss:$8 sps:$4 sm:$0xff]   ;;  %v90_v62 = vrot.slane %v73_v17, %v89_v58  ;;  %v1526_v17 = vld [vmem:[%s2046_s5 + $0x174] ss:$8 sps:$4 sm:$0xff]  }
  0x40   :  { %1344 = vmatprep.subr.bf16.mxu1 %v1551_v3  ;;  %v1523_v3 = vld [vmem:[%s2046_s5 + $0x164] ss:$8 sps:$4 sm:$0xff]  }
  0x42   :  { %337 = vmatmul.mubr.bf16.vlgmr.msra.gmra.mrb[4].mxu1 %v1707_v23  ;;  %844 = vmatpush1.bf16.msra.mxu0 %v1499_v63  ;;  %v352_v23 = vrot.slane %v347_v19, %v1873_v16  ;;  %v360_v63 = vrot.slane %v347_v19, %v85_v57 }
  0x43   :  { %845 = vmatprep.subr.bf16.mxu0 %v1500_v0  ;;  %1345 = vmatpush3.bf16.msra.mxu1 %v1552_v4  ;;  %v1518_v0 = vld [vmem:[%s2046_s5 + $0x150] ss:$8 sps:$4 sm:$0xff]  }
  0x44   :  { %1346 = vmatprep.subr.bf16.mxu1 %v1553_v5  ;;  %v390_v5 = vrot.slane %v1887_v21, %v85_v57 }
  0x46   :  { %846 = vmatpush1.bf16.msra.mxu0 %v1502_v1 }
  0x47   :  { %858 = vmatprep.subr.bf16.mxu0 %v1505_v2  ;;  %1347 = vmatpush3.bf16.msra.mxu1 %v1554_v6  ;;  %v364_v2 = vrot.slane %v347_v19, %v89_v58 }
  0x48   :  { %1348 = vmatprep.subr.bf16.mxu1 %v1555_v7 }
  0x4b   :  { %1349 = vmatpush3.bf16.msra.mxu1 %v1556_v8  ;;  %v394_v8 = vrot.slane %v1887_v21, %v89_v58 }
  0x4c   :  { %1350 = vmatprep.subr.bf16.mxu1 %v1557_v9 }
  0x4f   :  { %1351 = vmatpush3.bf16.msra.mxu1 %v1558_v10 }
  0x50   :  { %1352 = vmatprep.subr.bf16.mxu1 %v1559_v11 }
  0x53   :  { %1353 = vmatpush3.bf16.msra.mxu1 %v1560_v12 }
  0x54   :  { %1354 = vmatprep.subr.bf16.mxu1 %v1561_v13  ;;  %v1521_v13 = vld [vmem:[%s2046_s5 + $0x160] ss:$8 sps:$4 sm:$0xff]  }
  0xf5   :  { %v295_v24 = vpop.f32.mrb[0].mxu1 }
  0xf6   :  { %v296_v26 = vadd.f32 %v295_v24, %v78_v20  ;;  %v297_v28 = vpop.f32.mrb[1].mxu1 }
  0xf7   :  { %v298_v29 = vadd.f32 %v297_v28, %v82_v22  ;;  %v299_v30 = vpop.f32.mrb[2].mxu1  ;;  %v1529_v28 = vld [vmem:[%s2046_s5 + $0x184] ss:$8 sps:$4 sm:$0xff]  }
  0xf8   :  { %v369_v32 = vmul.f32 %v352_v23, %v296_v26  ;;  %v300_v33 = vadd.f32 %v299_v30, %v78_v20  ;;  %v301_v34 = vpop.f32.mrb[3].mxu1 }
  0xf9   :  { %v370_v35 = vmul.f32 %v356_v25, %v298_v29  ;;  %v302_v36 = vadd.f32 %v301_v34, %v82_v22  ;;  %v1532_v34 = vld [vmem:[%s2046_s5 + $0x194] ss:$8 sps:$4 sm:$0xff]  }
  0xfa   :  { %v399_v37 = vadd.f32 %v382_v27, %v369_v32  ;;  %v373_v38 = vmul.f32 %v352_v23, %v300_v33  ;;  %v1527_v32 = vld [vmem:[%s2046_s5 + $0x180] ss:$8 sps:$4 sm:$0xff]  }
  0xfb   :  { %v374_v39 = vmul.f32 %v356_v25, %v302_v36  ;;  %v400_v40 = vadd.f32 %v386_v31, %v370_v35  ;;  %v1524_v25 = vld [vmem:[%s2046_s5 + $0x170] ss:$8 sps:$4 sm:$0xff]   ;;  %v1535_v36 = vld [vmem:[%s2046_s5 + $0x1a4] ss:$8 sps:$4 sm:$0xff]  }
  0xfc   :  { %v403_v41 = vadd.f32 %v382_v27, %v373_v38  ;;  %v407_v43 = vmax.f32 %v399_v37, 0.0  ;;  %v1530_v35 = vld [vmem:[%s2046_s5 + $0x190] ss:$8 sps:$4 sm:$0xff]   ;;  %v1533_v37 = vld [vmem:[%s2046_s5 + $0x1a0] ss:$8 sps:$4 sm:$0xff]  }
  0xfd   :  { %v404_v42 = vadd.f32 %v386_v31, %v374_v39  ;;  %v408_v45 = vmax.f32 %v400_v40, 0.0  ;;  %v1538_v38 = vld [vmem:[%s2046_s5 + $0x1b4] ss:$8 sps:$4 sm:$0xff]   ;;  %v1536_v39 = vld [vmem:[%s2046_s5 + $0x1b0] ss:$8 sps:$4 sm:$0xff]  }
  0xfe   :  { %v411_v44 = vmax.f32 %v403_v41, 0.0  ;;  %v1541_v40 = vld [vmem:[%s2046_s5 + $0x1c4] ss:$8 sps:$4 sm:$0xff]   ;;  %v1539_v41 = vld [vmem:[%s2046_s5 + $0x1c0] ss:$8 sps:$4 sm:$0xff]  }
  0xff   :  { %v412_v46 = vmax.f32 %v404_v42, 0.0  ;;  %v1544_v42 = vld [vmem:[%s2046_s5 + $0x1d4] ss:$8 sps:$4 sm:$0xff]  }
 0x100   :  { %v415_v47 = vpack.c.bf16 %v411_v44, %v407_v43  ;;  %v1542_v43 = vld [vmem:[%s2046_s5 + $0x1d0] ss:$8 sps:$4 sm:$0xff]   ;;  %v1547_v44 = vld [vmem:[%s2046_s5 + $0x1e4] ss:$8 sps:$4 sm:$0xff]  }
 0x101   :  { %v416_v48 = vpack.c.bf16 %v412_v46, %v408_v45  ;;  %v1545_v45 = vld [vmem:[%s2046_s5 + $0x1e0] ss:$8 sps:$4 sm:$0xff]   ;;  %v1550_v46 = vld [vmem:[%s2046_s5 + $0x1f4] ss:$8 sps:$4 sm:$0xff]  }
 0x103   :  { %847 = vmatprep.mubr.bf16.mxu0 %v416_v48  ;;  %v1562_v48 = vld [vmem:[%s2047_s7 + $0x28] sm:$0xff]  }
 0x104   :  { %848 = vmatmul.mubr.bf16.vlgmr.msra.gmra.mrb[0].mxu0 %v415_v47  ;;  %v1548_v47 = vld [vmem:[%s2046_s5 + $0x1f0] ss:$8 sps:$4 sm:$0xff]   ;;  %1355 = vmatpush3.bf16.msra.mxu1 %v1562_v48 }
 0x105   :  { %859 = vmatpush1.bf16.msra.mxu0 %v1503_v49  ;;  %v1563_v49 = vld [vmem:[%s2047_s7 + $0x70] sm:$0xff]  }
 0x106   :  { %860 = vmatprep.subr.bf16.mxu0 %v1508_v50  ;;  %v1564_v50 = vld [vmem:[%s2047_s7 + $0x30] sm:$0xff]   ;;  %1356 = vmatprep.subr.bf16.mxu1 %v1563_v49 }
 0x108   :  { %1357 = vmatpush3.bf16.msra.mxu1 %v1564_v50 }
 0x109   :  { %861 = vmatpush1.bf16.msra.mxu0 %v1506_v51  ;;  %v1565_v51 = vld [vmem:[%s2047_s7 + $0x78] sm:$0xff]  }
 0x10a   :  { %862 = vmatprep.subr.bf16.mxu0 %v1511_v52  ;;  %v1566_v52 = vld [vmem:[%s2047_s7 + $0x38] sm:$0xff]   ;;  %1358 = vmatprep.subr.bf16.mxu1 %v1565_v51 }
 0x10c   :  { %1359 = vmatpush3.bf16.msra.mxu1 %v1566_v52 }
 0x10d   :  { %863 = vmatpush1.bf16.msra.mxu0 %v1509_v53  ;;  %v1576_v53 = vmov 0.0  }
 0x10e   :  { %864 = vmatprep.subr.bf16.mxu0 %v1514_v54  ;;  %1375 = vmatprep.subr.bf16.mxu1 %v1576_v53  ;;  %v483_v54 = vld [vmem:[%s2052_s6] sm:$0x3] }
 0x111   :  { %865 = vmatpush1.bf16.msra.mxu0 %v1512_v55  ;;  %v488_v55 = vrot.slane %v483_v54, %v1873_v16  ;;  %v1567_v16 = vld [vmem:[%s2051_s9] sm:$0xff]  }
 0x112   :  { %866 = vmatprep.subr.bf16.mxu0 %v1517_v56  ;;  %v492_v56 = vrot.slane %v483_v54, %v1878_v18  ;;  %v1568_v18 = vld [vmem:[%s2051_s9 + $0x8] sm:$0xff]  }
 0x115   :  { %867 = vmatpush1.bf16.msra.mxu0 %v1515_v59  ;;  %v338_v1 = vpop.f32.mrb[4].mxu1 }
 0x116   :  { %868 = vmatprep.subr.bf16.mxu0 %v1520_v60  ;;  %v339_v4 = vadd.f32 %v338_v1, %v86_v61  ;;  %v340_v6 = vpop.f32.mrb[5].mxu1 }
 0x117   :  { %v341_v7 = vadd.f32 %v340_v6, %v90_v62  ;;  %v342_v9 = vpop.f32.mrb[6].mxu1 }
 0x118   :  { %v371_v10 = vmul.f32 %v360_v63, %v339_v4  ;;  %v343_v11 = vadd.f32 %v342_v9, %v86_v61  ;;  %v344_v12 = vpop.f32.mrb[7].mxu1  ;;  %v1571_v9 = vld [vmem:[%s2051_s9 + $0x20] sm:$0xff]  }
 0x119   :  { %869 = vmatpush1.bf16.msra.mxu0 %v1518_v0  ;;  %v372_v14 = vmul.f32 %v364_v2, %v341_v7  ;;  %v345_v15 = vadd.f32 %v344_v12, %v90_v62  ;;  %v1569_v7 = vld [vmem:[%s2051_s9 + $0x10] sm:$0xff]   ;;  %v1574_v12 = vld [vmem:[%s2051_s9 + $0x38] sm:$0xff]  }
 0x11a   :  { %870 = vmatprep.subr.bf16.mxu0 %v1523_v3  ;;  %v401_v19 = vadd.f32 %v390_v5, %v371_v10  ;;  %v375_v20 = vmul.f32 %v360_v63, %v343_v11  ;;  %v1572_v10 = vld [vmem:[%s2051_s9 + $0x28] sm:$0xff]   ;;  %v1573_v11 = vld [vmem:[%s2051_s9 + $0x30] sm:$0xff]  }
 0x11b   :  { %v402_v22 = vadd.f32 %v394_v8, %v372_v14  ;;  %v376_v21 = vmul.f32 %v364_v2, %v345_v15  ;;  %v1309_v14 = vld [vmem:[%s2053_s8] ss:$0 sm:$0xff] }
 0x11c   :  { %v409_v23 = vmax.f32 %v401_v19, 0.0  ;;  %v405_v24 = vadd.f32 %v390_v5, %v375_v20 }
 0x11d   :  { %871 = vmatpush1.bf16.msra.mxu0 %v1521_v13  ;;  %v410_v26 = vmax.f32 %v402_v22, 0.0  ;;  %v406_v27 = vadd.f32 %v394_v8, %v376_v21  ;;  %v1570_v8 = vld [vmem:[%s2051_s9 + $0x18] sm:$0xff]  }
 0x11e   :  { %872 = vmatprep.subr.bf16.mxu0 %v1526_v17  ;;  %v413_v29 = vmax.f32 %v405_v24, 0.0 }
 0x11f   :  { %v414_v30 = vmax.f32 %v406_v27, 0.0  ;;  %v1326_v27 = vld [vmem:[%s2054_s10] ss:$0 sm:$0xff] }
 0x120   :  { %v417_v31 = vpack.c.bf16 %v413_v29, %v409_v23 }
 0x121   :  { %873 = vmatpush1.bf16.msra.mxu0 %v1524_v25  ;;  %v418_v33 = vpack.c.bf16 %v414_v30, %v410_v26 }
 0x122   :  { %874 = vmatprep.subr.bf16.mxu0 %v1529_v28 }
 0x123   :  { %890 = vmatprep.mubr.bf16.mxu0 %v418_v33 }
 0x125   :  { %875 = vmatpush1.bf16.msra.mxu0 %v1527_v32 }
 0x126   :  { %876 = vmatprep.subr.bf16.mxu0 %v1532_v34 }
 0x129   :  { %877 = vmatpush1.bf16.msra.mxu0 %v1530_v35 }
 0x12a   :  { %878 = vmatprep.subr.bf16.mxu0 %v1535_v36 }
 0x12d   :  { %879 = vmatpush1.bf16.msra.mxu0 %v1533_v37 }
 0x12e   :  { %880 = vmatprep.subr.bf16.mxu0 %v1538_v38 }
 0x131   :  { %881 = vmatpush1.bf16.msra.mxu0 %v1536_v39 }
 0x132   :  { %882 = vmatprep.subr.bf16.mxu0 %v1541_v40 }
 0x135   :  { %883 = vmatpush1.bf16.msra.mxu0 %v1539_v41 }
 0x136   :  { %884 = vmatprep.subr.bf16.mxu0 %v1544_v42 }
 0x139   :  { %885 = vmatpush1.bf16.msra.mxu0 %v1542_v43 }
 0x13a   :  { %886 = vmatprep.subr.bf16.mxu0 %v1547_v44 }
 0x13d   :  { %887 = vmatpush1.bf16.msra.mxu0 %v1545_v45 }
 0x13e   :  { %888 = vmatprep.subr.bf16.mxu0 %v1550_v46 }
 0x141   :  { %889 = vmatpush1.bf16.msra.mxu0 %v1548_v47 }
 0x144   :  { %891 = vmatmul.mubr.bf16.vlgmr.msra.gmra.mrb[0].mxu0 %v417_v31 }
 0x217   :  { %v892_v57 = vpop.f32.mrb[0].mxu0 }
 0x218   :  { %v1395_v58 = vadd.f32 %v892_v57, %v488_v55  ;;  %v894_v59 = vpop.f32.mrb[1].mxu0 }
 0x219   :  { %v1396_v60 = vadd.f32 %v894_v59, %v492_v56  ;;  %v896_v61 = vpop.f32.mrb[2].mxu0 }
 0x21a   :  { %v1397_v62 = vadd.f32 %v896_v61, %v488_v55  ;;  %v898_v63 = vpop.f32.mrb[3].mxu0  ;;  %v901_v1 = vmax.f32 %v1395_v58, 0.0 }
 0x21b   :  { %v1398_v0 = vadd.f32 %v898_v63, %v492_v56  ;;  %v902_v3 = vmax.f32 %v1396_v60, 0.0 }
 0x21c   :  { %v903_v2 = vmax.f32 %v1397_v62, 0.0 }
 0x21d   :  { %v904_v4 = vmax.f32 %v1398_v0, 0.0 }
 0x21e   :  { %v905_v5 = vpack.c.bf16 %v903_v2, %v901_v1 }
 0x21f   :  { %v906_v6 = vpack.c.bf16 %v904_v4, %v902_v3 }
 0x221   :  { %1074 = vmatprep.mubr.bf16.mxu1 %v906_v6 }
 0x222   :  { %1075 = vmatmul.mubr.bf16.vlgmr.msra.gmra.mrb[8].mxu1 %v905_v5 }
 0x223   :  { %1376 = vmatpush3.bf16.msra.mxu1 %v1567_v16  ;;  %1391 = vmatprep.mubr.msk.bf16.mxu1 %vm1577_vm0, %v1576_v53 }
 0x224   :  { %1377 = vmatprep.subr.bf16.mxu1 %v1576_v53 }
 0x227   :  { %1378 = vmatpush3.bf16.msra.mxu1 %v1568_v18 }
 0x228   :  { %1379 = vmatprep.subr.bf16.mxu1 %v1576_v53 }
 0x22b   :  { %1380 = vmatpush3.bf16.msra.mxu1 %v1569_v7 }
 0x22c   :  { %1381 = vmatprep.subr.bf16.mxu1 %v1576_v53 }
 0x22f   :  { %1382 = vmatpush3.bf16.msra.mxu1 %v1570_v8 }
 0x230   :  { %1383 = vmatprep.subr.bf16.mxu1 %v1576_v53 }
 0x233   :  { %1384 = vmatpush3.bf16.msra.mxu1 %v1571_v9 }
 0x234   :  { %1385 = vmatprep.subr.bf16.mxu1 %v1576_v53 }
 0x237   :  { %1386 = vmatpush3.bf16.msra.mxu1 %v1572_v10 }
 0x238   :  { %1387 = vmatprep.subr.bf16.mxu1 %v1576_v53 }
 0x23b   :  { %1388 = vmatpush3.bf16.msra.mxu1 %v1573_v11 }
 0x23c   :  { %1389 = vmatprep.subr.bf16.mxu1 %v1576_v53 }
 0x23f   :  { %1390 = vmatpush3.bf16.msra.mxu1 %v1574_v12 }
 0x2f5   :  { %v1360_v13 = vpop.f32.mrb[8].mxu1 }
 0x2f6   :  { %v1361_v15 = vpop.f32.mrb[9].mxu1 }
 0x2f7   :  { %v1362_v17 = vadd.f32 %v1361_v15, %v1360_v13  ;;  %v1363_v19 = vpop.f32.mrb[10].mxu1 }
 0x2f8   :  { %v1364_v20 = vpop.f32.mrb[11].mxu1 }
 0x2f9   :  { %v1077_v22 = vadd.f32 %v1362_v17, %v1309_v14  ;;  %v1365_v21 = vadd.f32 %v1364_v20, %v1363_v19 }
 0x2fb   :  { %v1080_v23 = vadd.f32 %v1365_v21, %v1309_v14  ;;  %v1083_v24 = vmax.f32 %v1077_v22, 0.0 }
 0x2fd   :  { %v1084_v25 = vmax.f32 %v1080_v23, 0.0 }
 0x2ff   :  { %v1085_v26 = vpack.c.bf16 %v1084_v25, %v1083_v24 }
 0x301   :  { %1392 = vmatmul.mubr.bf16.vlgmr.msra.gmra.mrb[12].mxu1 %v1085_v26 }
 0x3d4   :  { %v1191_v28 = vpop.f32.mrb[12].mxu1 }
 0x3d5   :  { %v1393_v29 = vpop.f32.mrb[13].mxu1  ;;  %v1192_v31 = vadd.f32 %v1326_v27, %v1191_v28 }
 0x3d6   :  { %v1194_v30 = vpop.f32.mrb[14].mxu1 }
 0x3d7   :  { %v1195_v32 = vadd.f32 %v1326_v27, %v1194_v30  ;;  %v1394_v33 = vpop.f32.mrb[15].mxu1 }
 0x3d9   :  { %v1342_v34 = vpack.c.bf16 %v1195_v32, %v1192_v31 }
 0x3db   :  { %1343 = vst [vmem:[%s2055_s11] sm:$0xff] %v1342_v34  }

</bundles_post_ra>
